<compile_context>
chip_gen: v7x
topology: tpu7x:2x2x1
jax: 0.10.0
libtpu: 0.0.40
codegen_flags: <defaults>
</compile_context>

<pallas_src>
import functools

import jax
import jax.numpy as jnp
from jax.experimental import pallas as pl
from jax.experimental.pallas import tpu as pltpu


def _round_up(x, m):
    return (x + m - 1) // m * m


def _smoothquant_linear_kernel(x_ref, s_ref, w_ref, b_ref, o_ref, acc_ref):
    """Computes one (tm, tn) output tile; K is the innermost (reduction) axis.

    x_ref: (tm, tk)   activations
    s_ref: (1, tk)    1 / multiplier  (f32, precomputed at init)
    w_ref: (tk, tn)   weight, already scaled by `multiplier` and transposed
    b_ref: (1, tn)    bias (f32)
    o_ref: (tm, tn)   output tile
    acc_ref: (tm, tn) f32 VMEM accumulator (persists across the K grid axis)
    """
    k = pl.program_id(2)

    @pl.when(k == 0)
    def _init():
        acc_ref[...] = jnp.zeros_like(acc_ref)

    # SmoothQuant activation rescale: one VPU multiply by the f32 reciprocal
    # (computed once at init), then cast to the MXU input dtype.
    x_scaled = (x_ref[...].astype(jnp.float32) * s_ref[...]).astype(w_ref.dtype)
    # MXU matmul against the pre-scaled / pre-transposed weight, f32 accumulate.
    acc_ref[...] += jnp.dot(x_scaled, w_ref[...],
                            preferred_element_type=jnp.float32)

    @pl.when(k == pl.num_programs(2) - 1)
    def _finalize():
        # Single cast + store epilogue (one vst per tile; v5e has 1 vst slot).
        o_ref[...] = (acc_ref[...] + b_ref[...]).astype(o_ref.dtype)


@functools.partial(jax.jit, static_argnames=("tm", "tn", "tk"))
def _smoothquant_linear_tiled(x2, inv_s, w_t, b2, *, tm, tn, tk):
    """x2: (Mp, Kp), inv_s: (1, Kp) f32, w_t: (Kp, Np), b2: (1, Np) f32."""
    Mp, Kp = x2.shape
    Np = w_t.shape[1]
    grid = (Mp // tm, Np // tn, Kp // tk)

    # Scoped-VMEM request with headroom: double-buffered input tiles + output
    # tile + f32 accumulator.  Kept within the tightest (16 MiB) default.
    elt = x2.dtype.itemsize
    tile_bytes = (2 * elt * (tm * tk + tk * tn + tk + tn)   # double-buffered ins
                  + 2 * elt * tm * tn                       # double-buffered out
                  + 4 * tm * tn)                            # f32 accumulator
    vmem_limit = int(min(max(4 * tile_bytes, 16 * 1024 * 1024),
                         64 * 1024 * 1024))

    return pl.pallas_call(
        _smoothquant_linear_kernel,
        out_shape=jax.ShapeDtypeStruct((Mp, Np), x2.dtype),
        grid_spec=pltpu.PrefetchScalarGridSpec(
            num_scalar_prefetch=0,
            grid=grid,
            in_specs=[
                pl.BlockSpec((tm, tk), lambda i, j, k: (i, k)),  # activations
                pl.BlockSpec((1, tk), lambda i, j, k: (0, k)),   # 1/multiplier
                pl.BlockSpec((tk, tn), lambda i, j, k: (k, j)),  # scaled W^T
                pl.BlockSpec((1, tn), lambda i, j, k: (0, j)),   # bias
            ],
            out_specs=pl.BlockSpec((tm, tn), lambda i, j, k: (i, j)),
            scratch_shapes=[pltpu.VMEM((tm, tn), jnp.float32)],
        ),
        compiler_params=pltpu.CompilerParams(
            dimension_semantics=("parallel", "parallel", "arbitrary"),
            vmem_limit_bytes=vmem_limit,
        ),
    )(x2, inv_s, w_t, b2)


class SmoothQuantLinearLike:
    """JAX/Pallas port of Quark's SmoothQuantLinearLike wrapping nn.Linear.

    All call-invariant layout work (weight scaling + transpose + zero-padding,
    multiplier reciprocal, bias reshape/cast) is done once at init so the
    per-call path is a single tiled pallas_call.
    """

    def __init__(self, weight, bias, scales, compute_dtype=None):
        # weight: (out_features, in_features); scales: (in,) or (1, in)
        scales = jnp.asarray(scales).reshape(-1).astype(jnp.float32)
        weight = jnp.asarray(weight)
        self.out_features, self.in_features = weight.shape
        assert scales.shape[0] == self.in_features

        # Buffer kept for parity with the PyTorch module.
        self.multiplier = scales

        # __init__ behaviour of the PyTorch module: weight.mul_(scales).
        w_scaled = weight.astype(jnp.float32) * scales[None, :]

        # compute_dtype=jnp.bfloat16 feeds the MXU bf16 (f32 accumulation kept)
        # for ~2x MXU throughput on v6e/v7x; default keeps the input dtype.
        cdt = weight.dtype if compute_dtype is None else compute_dtype
        self.compute_dtype = cdt

        # Lane-dense, MXU-friendly static tile sizes for K and N.
        K, N = self.in_features, self.out_features
        self.tk = min(512, _round_up(K, 128))
        self.tn = min(256, _round_up(N, 128))
        Kp = _round_up(K, self.tk)
        Np = _round_up(N, self.tn)
        self.Kp, self.Np = Kp, Np

        # Hoisted constants, already padded to the tiled shapes.
        self.w_t = jnp.pad(w_scaled.T, ((0, Kp - K), (0, Np - N))).astype(cdt)
        # f32 reciprocal of the multiplier (padded K lanes are inert: x pad=0).
        self.inv_multiplier = jnp.pad(1.0 / scales, (0, Kp - K),
                                      constant_values=1.0).reshape(1, Kp)
        b = (jnp.zeros((N,), jnp.float32) if bias is None
             else jnp.asarray(bias).astype(jnp.float32))
        self.bias = jnp.pad(b, (0, Np - N)).reshape(1, Np)

    def __call__(self, x):
        lead = x.shape[:-1]
        K, N = self.in_features, self.out_features
        x2 = x.reshape(-1, K).astype(self.compute_dtype)
        M = x2.shape[0]

        tm = 128 if M >= 128 else _round_up(max(M, 1), 8)
        Mp = _round_up(M, tm)
        if Mp != M or self.Kp != K:
            x2 = jnp.pad(x2, ((0, Mp - M), (0, self.Kp - K)))

        out = _smoothquant_linear_tiled(x2, self.inv_multiplier, self.w_t,
                                        self.bias, tm=tm, tn=self.tn,
                                        tk=self.tk)
        out = out[:M, :N]
        return out.reshape(*lead, N).astype(x.dtype)


if __name__ == "__main__":
    # Shapes implied by the module wrapping an nn.Linear:
    #   batch=2, seq=8, in_features=32, out_features=64
    B, S, K, N = 2, 8, 32, 64

    key = jax.random.PRNGKey(0)
    kx, kw, kb, ks = jax.random.split(key, 4)

    x = jax.random.normal(kx, (B, S, K), dtype=jnp.float32)
    weight = jax.random.normal(kw, (N, K), dtype=jnp.float32) * 0.05  # [out, in]
    bias = jax.random.normal(kb, (N,), dtype=jnp.float32) * 0.1
    # SmoothQuant scales: positive per-input-channel scales, shape [in_features]
    scales = jnp.exp(0.3 * jax.random.normal(ks, (K,), dtype=jnp.float32))

    mod = SmoothQuantLinearLike(weight, bias, scales)
    y = mod(x)
    y = jax.block_until_ready(y)

    # Reference: the PyTorch forward math, y = (x / scales) @ (W * scales)^T + b
    w_scaled = weight * scales[None, :]
    y_ref = (x / scales[None, None, :]) @ w_scaled.T + bias[None, None, :]

    assert y.shape == (B, S, N)
    assert jnp.allclose(y, y_ref, atol=1e-4, rtol=1e-4), \
        float(jnp.max(jnp.abs(y - y_ref)))

    print("KERNEL_OK")
</pallas_src>

<mosaic_0001>
module attributes {stable_mosaic.version = 11 : i64} {
  func.func @_smoothquant_linear_kernel(%arg0: i32, %arg1: i32, %arg2: i32, %arg3: memref<16x128xf32, #tpu.memory_space<vmem>>, %arg4: memref<1x128xf32, #tpu.memory_space<vmem>>, %arg5: memref<128x128xf32, #tpu.memory_space<vmem>>, %arg6: memref<1x128xf32, #tpu.memory_space<vmem>>, %arg7: memref<16x128xf32, #tpu.memory_space<vmem>>, %arg8: memref<16x128xf32, #tpu.memory_space<vmem>>) attributes {dimension_semantics = [#tpu.dimension_semantics<parallel>, #tpu.dimension_semantics<parallel>, #tpu.dimension_semantics<arbitrary>], iteration_bounds = array<i64: 1, 1, 1>, scalar_prefetch = 0 : i64, scratch_operands = 1 : i64, tpu.core_type = #tpu.core_type<tc>, window_params = [{transform_indices = @transform_0, window_bounds = array<i64: 16, 128>}, {transform_indices = @transform_1, window_bounds = array<i64: 1, 128>}, {transform_indices = @transform_2, window_bounds = array<i64: 128, 128>}, {transform_indices = @transform_3, window_bounds = array<i64: 1, 128>}, {transform_indices = @transform_4, window_bounds = array<i64: 16, 128>}]} {
    %c0_i32 = arith.constant 0 : i32
    %0 = arith.cmpi eq, %arg2, %c0_i32 : i32
    %1 = arith.extui %0 : i1 to i32
    %c0_i32_0 = arith.constant 0 : i32
    %2 = arith.cmpi ne, %1, %c0_i32_0 : i32
    scf.if %2 {
      %cst_12 = arith.constant 0.000000e+00 : f32
      %15 = vector.broadcast %cst_12 : f32 to vector<16x128xf32>
      %c0_13 = arith.constant 0 : index
      %c0_14 = arith.constant 0 : index
      %16 = vector.load %arg8[%c0_13, %c0_14] : memref<16x128xf32, #tpu.memory_space<vmem>>, vector<16x128xf32>
      tpu.vector_store %arg8[%c0_13, %c0_14], %15 {strides = array<i32>} : memref<16x128xf32, #tpu.memory_space<vmem>>, vector<16x128xf32>,
    } else {
    }
    %c0 = arith.constant 0 : index
    %c0_1 = arith.constant 0 : index
    %3 = vector.load %arg3[%c0, %c0_1] : memref<16x128xf32, #tpu.memory_space<vmem>>, vector<16x128xf32>
    %c0_2 = arith.constant 0 : index
    %c0_3 = arith.constant 0 : index
    %4 = vector.load %arg4[%c0_2, %c0_3] : memref<1x128xf32, #tpu.memory_space<vmem>>, vector<1x128xf32>
    %5 = vector.broadcast %4 : vector<1x128xf32> to vector<16x128xf32>
    %6 = arith.mulf %3, %5 : vector<16x128xf32>
    %c0_4 = arith.constant 0 : index
    %c0_5 = arith.constant 0 : index
    %7 = vector.load %arg8[%c0_4, %c0_5] : memref<16x128xf32, #tpu.memory_space<vmem>>, vector<16x128xf32>
    %c0_6 = arith.constant 0 : index
    %c0_7 = arith.constant 0 : index
    %8 = vector.load %arg5[%c0_6, %c0_7] : memref<128x128xf32, #tpu.memory_space<vmem>>, vector<128x128xf32>
    %cst = arith.constant dense<0.000000e+00> : vector<16x128xf32>
    %9 = tpu.matmul %6, %8, %cst {dimension_numbers = #tpu.dot_dimension_numbers<[1], [0], [0], [1], [0, 0, 1, 1], [], []>} : vector<16x128xf32>, vector<128x128xf32>, vector<16x128xf32> -> vector<16x128xf32>
    %10 = arith.addf %7, %9 : vector<16x128xf32>
    %c0_8 = arith.constant 0 : index
    %c0_9 = arith.constant 0 : index
    %11 = vector.load %arg8[%c0_8, %c0_9] : memref<16x128xf32, #tpu.memory_space<vmem>>, vector<16x128xf32>
    tpu.vector_store %arg8[%c0_8, %c0_9], %10 {strides = array<i32>} : memref<16x128xf32, #tpu.memory_space<vmem>>, vector<16x128xf32>,
    %c0_i32_10 = arith.constant 0 : i32
    %12 = arith.cmpi eq, %arg2, %c0_i32_10 : i32
    %13 = arith.extui %12 : i1 to i32
    %c0_i32_11 = arith.constant 0 : i32
    %14 = arith.cmpi ne, %13, %c0_i32_11 : i32
    scf.if %14 {
      %c0_12 = arith.constant 0 : index
      %c0_13 = arith.constant 0 : index
      %15 = vector.load %arg8[%c0_12, %c0_13] : memref<16x128xf32, #tpu.memory_space<vmem>>, vector<16x128xf32>
      %c0_14 = arith.constant 0 : index
      %c0_15 = arith.constant 0 : index
      %16 = vector.load %arg6[%c0_14, %c0_15] : memref<1x128xf32, #tpu.memory_space<vmem>>, vector<1x128xf32>
      %17 = vector.broadcast %16 : vector<1x128xf32> to vector<16x128xf32>
      %18 = arith.addf %15, %17 : vector<16x128xf32>
      %c0_16 = arith.constant 0 : index
      %c0_17 = arith.constant 0 : index
      %19 = vector.load %arg7[%c0_16, %c0_17] : memref<16x128xf32, #tpu.memory_space<vmem>>, vector<16x128xf32>
      tpu.vector_store %arg7[%c0_16, %c0_17], %18 {strides = array<i32>} : memref<16x128xf32, #tpu.memory_space<vmem>>, vector<16x128xf32>,
    } else {
    }
    return
  }
  func.func @transform_0(%arg0: i32, %arg1: i32, %arg2: i32) -> (i32, i32) {
    %c0_i32 = arith.constant 0 : i32
    return %arg0, %arg2 : i32, i32
  }
  func.func @transform_1(%arg0: i32, %arg1: i32, %arg2: i32) -> (i32, i32) {
    %c0_i32 = arith.constant 0 : i32
    %c0_i32_0 = arith.constant 0 : i32
    return %c0_i32, %arg2 : i32, i32
  }
  func.func @transform_2(%arg0: i32, %arg1: i32, %arg2: i32) -> (i32, i32) {
    %c0_i32 = arith.constant 0 : i32
    return %arg2, %arg1 : i32, i32
  }
  func.func @transform_3(%arg0: i32, %arg1: i32, %arg2: i32) -> (i32, i32) {
    %c0_i32 = arith.constant 0 : i32
    %c0_i32_0 = arith.constant 0 : i32
    return %c0_i32, %arg1 : i32, i32
  }
  func.func @transform_4(%arg0: i32, %arg1: i32, %arg2: i32) -> (i32, i32) {
    %c0_i32 = arith.constant 0 : i32
    return %arg0, %arg1 : i32, i32
  }
}

</mosaic_0001>

<bundles_post_ra>
// kernel: _smoothquant_linear_tiled.1
= control target key start
LH: loop header
LB: loop body
LE: loop exit
PB: predicated region body
PF: predicated region fallthrough
CT: control target
= control target key end

     0   :  { %9 = vsyncpa [#allocation4], 0  ;;  %s439_s0 = inlined_call_operand.hbm [shape: f32[16,128], index: 0, kind: input, shape index: {}]   ;;  %s440_s1 = inlined_call_operand.vmem [shape: f32[1,128], index: 1, kind: input, shape index: {}]   ;;  %s441_s2 = inlined_call_operand.hbm [shape: f32[128,128], index: 2, kind: input, shape index: {}]   ;;  %s442_s3 = inlined_call_operand.vmem [shape: f32[1,128], index: 3, kind: input, shape index: {}]   ;;  %s443_s4 = inlined_call_operand.hbm [shape: f32[16,128], index: 4, kind: output, shape index: {}]  }
   0x1   :  { %10 = vsyncpa [#allocation7], 0 }
   0x2   :  { %11 = vsyncpa [#allocation5], 0  ;;  %s358_s15 = smov [#allocation3]   ;;  %s286_s19 = scalar_lea.hbm %s439_s0, 256 }
   0x3   :  { %s17_s16 = sshll.u32 %s358_s15, 4  ;;  %p287_p0 = scmp.ne.s32.totalorder %s439_s0, %s286_s19  ;;  %s18_s16 = int_to_ptr.vmem [resolvable:$true] %s17_s16 }
   0x4   :  { %p290_p1 = scmp.lt.u32.totalorder %s286_s19, %s439_s0 }
   0x6   :  { %p292_p2 = pnand %p290_p1, %p287_p0 }
   0x8   :  { %295 = shalt.err (!%p292_p2)
}
   0x9   :  { %s296_s24 = scalar_lea.vmem %s18_s16, 256  ;;  %p301_p4 = scmp.lt.s32.totalorder %s18_s16, %s18_s16 }
   0xa   :  { %p297_p3 = scmp.ne.s32.totalorder %s18_s16, %s296_s24  ;;  %p302_p5 = scmp.lt.s32.totalorder %s296_s24, %s296_s24 }
   0xc   :  { %p303_p6 = por %p302_p5, %p301_p4 }
   0xe   :  { %p304_p7 = pnand %p303_p6, %p297_p3 }
  0x10   :  { %307 = shalt.err (!%p304_p7)
}
  0x11   :  { %s359_s25 = smov 128   ;;  %s360_s26 = smov 8  }
  0x12   :  { %23 = dma.hbm_to_vmem [thread:$0]  %s439_s0, 256, %s18_s16, [#allocation4], %s359_s25, %s359_s25, %s360_s26  }
  0x13   :  { %s361_s29 = smov [#allocation6]   ;;  %s308_s7 = scalar_lea.hbm %s441_s2, 2048 }
  0x14   :  { %s31_s30 = sshll.u32 %s361_s29, 4  ;;  %p309_p8 = scmp.ne.s32.totalorder %s441_s2, %s308_s7  ;;  %s32_s30 = int_to_ptr.vmem [resolvable:$true] %s31_s30 }
  0x15   :  { %p312_p9 = scmp.lt.u32.totalorder %s308_s7, %s441_s2 }
  0x17   :  { %p314_p10 = pnand %p312_p9, %p309_p8 }
  0x19   :  { %317 = shalt.err (!%p314_p10)
}
  0x1a   :  { %s318_s12 = scalar_lea.vmem %s32_s30, 2048  ;;  %p323_p12 = scmp.lt.s32.totalorder %s32_s30, %s32_s30 }
  0x1b   :  { %p319_p11 = scmp.ne.s32.totalorder %s32_s30, %s318_s12  ;;  %p324_p13 = scmp.lt.s32.totalorder %s318_s12, %s318_s12 }
  0x1d   :  { %p325_p0 = por %p324_p13, %p323_p12 }
  0x1f   :  { %p326_p1 = pnand %p325_p0, %p319_p11 }
  0x21   :  { %329 = shalt.err (!%p326_p1)
}
  0x22   :  { %37 = dma.hbm_to_vmem [thread:$0]  %s441_s2, 2048, %s32_s30, [#allocation7], %s359_s25, %s359_s25, %s360_s26  }
  0x23   :  { %352 = dma.done.wait [#allocation4], 256  }
  0x24   :  { %353 = vsyncadd [#allocation4], 4294967040 }
  0x25   :  { %354 = dma.done.wait [#allocation7], 2048  }
  0x26   :  { %355 = vsyncadd [#allocation7], 4294965248  ;;  %v65_v0 = vld [vmem:[#allocation6] sm:$0xff]  ;;  %v66_v1 = vld [vmem:[#allocation6 + $0x8] sm:$0xff]  ;;  %s362_s16 = smov [#allocation8]  }
  0x27   :  { %v67_v2 = vld [vmem:[#allocation6 + $0x10] sm:$0xff]  ;;  %v249_v3 = vpack.c.bf16 %v66_v1, %v65_v0  ;;  %v68_v4 = vld [vmem:[#allocation6 + $0x18] sm:$0xff]  ;;  %v69_v6 = vld [vmem:[#allocation6 + $0x20] sm:$0xff]  ;;  %s181_s17 = sshll.u32 %s362_s16, 4  ;;  %s182_s17 = int_to_ptr.vmem [resolvable:$true] %s181_s17 }
  0x28   :  { %v253_v5 = vpack.c.bf16 %v68_v4, %v67_v2  ;;  %v70_v7 = vld [vmem:[#allocation6 + $0x28] sm:$0xff]  ;;  %v52_v9 = vld [vmem:[#allocation3] sm:$0xff]  ;;  %v72_v11 = vld [vmem:[#allocation6 + $0x38] sm:$0xff]  ;;  %s330_s18 = scalar_lea.vmem %s182_s17, 256  ;;  %p335_p3 = scmp.lt.s32.totalorder %s182_s17, %s182_s17 }
  0x29   :  { %250 = vmatprep.subr.bf16.mxu0 %v249_v3  ;;  %v257_v8 = vpack.c.bf16 %v70_v7, %v69_v6  ;;  %v71_v10 = vld [vmem:[#allocation6 + $0x30] sm:$0xff]  ;;  %v73_v15 = vld [vmem:[#allocation6 + $0x40] sm:$0xff]  ;;  %v74_v16 = vld [vmem:[#allocation6 + $0x48] sm:$0xff]  ;;  %p331_p2 = scmp.ne.s32.totalorder %s182_s17, %s330_s18  ;;  %p336_p4 = scmp.lt.s32.totalorder %s330_s18, %s330_s18 }
  0x2a   :  { %252 = vmatpush3.bf16.msra.mxu0 %v249_v3  ;;  %v194_v12 = vld [vmem:[%s440_s1] ss:$0 sm:$0xff]  ;;  %v261_v14 = vpack.c.bf16 %v72_v11, %v71_v10  ;;  %v265_v17 = vpack.c.bf16 %v74_v16, %v73_v15  ;;  %v76_v19 = vld [vmem:[#allocation6 + $0x58] sm:$0xff]  ;;  %v77_v21 = vld [vmem:[#allocation6 + $0x60] sm:$0xff] }
  0x2b   :  { %254 = vmatprep.subr.bf16.mxu0 %v253_v5  ;;  %v61_v13 = vmul.f32 %v194_v12, %v52_v9  ;;  %v75_v18 = vld [vmem:[#allocation6 + $0x50] sm:$0xff]  ;;  %v78_v22 = vld [vmem:[#allocation6 + $0x68] sm:$0xff]  ;;  %v80_v25 = vld [vmem:[#allocation6 + $0x78] sm:$0xff]  ;;  %p337_p5 = por %p336_p4, %p335_p3 }
  0x2c   :  { %v269_v20 = vpack.c.bf16 %v76_v19, %v75_v18  ;;  %v273_v23 = vpack.c.bf16 %v78_v22, %v77_v21  ;;  %v79_v24 = vld [vmem:[#allocation6 + $0x70] sm:$0xff]  ;;  %v53_v27 = vld [vmem:[#allocation3 + $0x8] sm:$0xff] }
  0x2d   :  { %246 = vmatprep.mubr.f32.mxu0 %v61_v13  ;;  %v277_v26 = vpack.c.bf16 %v80_v25, %v79_v24  ;;  %v62_v28 = vmul.f32 %v194_v12, %v53_v27  ;;  %v195_v29 = vld [vmem:[%s442_s3] ss:$0 sm:$0xff]  ;;  %p338_p6 = pnand %p337_p5, %p331_p2 }
  0x2e   :  { %256 = vmatpush3.bf16.msra.mxu0 %v253_v5 }
  0x2f   :  { %258 = vmatprep.subr.bf16.mxu0 %v257_v8 }
  0x32   :  { %260 = vmatpush3.bf16.msra.mxu0 %v257_v8 }
  0x33   :  { %262 = vmatprep.subr.bf16.mxu0 %v261_v14 }
  0x36   :  { %264 = vmatpush3.bf16.msra.mxu0 %v261_v14 }
  0x37   :  { %266 = vmatprep.subr.bf16.mxu0 %v265_v17 }
  0x3a   :  { %268 = vmatpush3.bf16.msra.mxu0 %v265_v17 }
  0x3b   :  { %270 = vmatprep.subr.bf16.mxu0 %v269_v20 }
  0x3e   :  { %272 = vmatpush3.bf16.msra.mxu0 %v269_v20 }
  0x3f   :  { %274 = vmatprep.subr.bf16.mxu0 %v273_v23 }
  0x42   :  { %276 = vmatpush3.bf16.msra.mxu0 %v273_v23 }
  0x43   :  { %278 = vmatprep.subr.bf16.mxu0 %v277_v26 }
  0x46   :  { %280 = vmatpush3.bf16.msra.mxu0 %v277_v26 }
  0x49   :  { %247 = vmatmul.mubr.f32.vlgmr.msra.gmra.mrb[0].mxu0 %v62_v28 }
 0x11c   :  { %v248_v30 = vpop.f32.mrb[0].mxu0 }
 0x11d   :  { %v173_v31 = vadd.f32 %v248_v30, %v195_v29  ;;  %v147_v32 = vpop.f32.mrb[1].mxu0 }
 0x11e   :  { %v172_v33 = vadd.f32 %v195_v29, %v147_v32 }
 0x11f   :  { %175 = vst [vmem:[#allocation8 + $0x8] sm:$0xff] %v173_v31 }
 0x120   :  { %174 = vst [vmem:[#allocation8] sm:$0xff] %v172_v33 }
 0x121   :  { %341 = shalt.err (!%p338_p6)
}
 0x122   :  { %s342_s3 = scalar_lea.hbm %s443_s4, 256 }
 0x123   :  { %p343_p7 = scmp.ne.s32.totalorder %s443_s4, %s342_s3  ;;  %p346_p8 = scmp.lt.u32.totalorder %s342_s3, %s443_s4 }
 0x125   :  { %p348_p9 = pnand %p346_p8, %p343_p7 }
 0x127   :  { %351 = shalt.err (!%p348_p9)
}
 0x128   :  { %187 = dma.vmem_to_hbm [thread:$0]  %s182_s17, 256, %s443_s4, [#allocation5], %s359_s25, %s359_s25, %s360_s26  }
 0x129   :  { %356 = dma.done.wait [#allocation5], 256  }
 0x12a   :  { %357 = vsyncadd [#allocation5], 4294967040 }
 0x12b   :  { %191 = vsyncpa [#allocation4], 1 }
 0x12c   :  { %192 = vsyncpa [#allocation7], 1 }
 0x12d   :  { %193 = vsyncpa [#allocation5], 1 }

</bundles_post_ra>
